<compile_context>
chip_gen: v6e
topology: v6e:2x2x1
jax: 0.10.0
libtpu: 0.0.40
codegen_flags: <defaults>
</compile_context>

<pallas_src>
import math
from functools import partial
from typing import NamedTuple, Tuple

import numpy as np
import jax
import jax.numpy as jnp
from jax.experimental import pallas as pl
from jax.experimental.pallas import tpu as pltpu


def _round_up(n, m):
    return ((n + m - 1) // m) * m


def _conv_as_matrix(w, length_in, kernel, stride):
    """Dense (L_in, L_out) f64 matrix equivalent to ConstantPad1d + Conv1d(1,1,K,S,bias=False)."""
    left = max(kernel - stride, 0)           # torch: ceil(max(k - s, 0))
    right = kernel - 1
    length_pad = length_in + left + right
    length_out = (length_pad - kernel) // stride + 1
    i = np.arange(length_in)[:, None]
    t = np.arange(length_out)[None, :]
    j = i + left - t * stride                # kernel tap hit by input sample i at output t
    valid = (j >= 0) & (j < kernel)
    w = np.asarray(w, np.float64)
    mat = np.where(valid, w[np.clip(j, 0, kernel - 1)], 0.0)
    return mat, length_out


class FENetConfig(NamedTuple):
    n_layers: int
    n_feat: int
    L0_true: int
    L0_pad: int
    total_cols: int
    col_starts: Tuple[int, ...]
    col_widths: Tuple[int, ...]
    slopes: Tuple[float, ...]
    inv_lens: Tuple[float, ...]


def build_fenet_params(feat_w, pass_w, kernels, strides, relu_powers, n_samples):
    """Host-side, once per model: f64-precomposed, lane-padded, fused bf16 weight matrix."""
    n_layers = len(kernels)
    assert len(strides) == n_layers and len(relu_powers) == n_layers
    layer_slopes = [-1.0 / (2 ** int(p)) for p in relu_powers]     # LeakyReLU negative slopes

    L0 = int(n_samples)
    L0_pad = _round_up(L0, 128)

    # Compose the linear pass chain in float64 and collect per-layer feat matrices.
    chain = np.eye(L0, dtype=np.float64)
    blocks, true_lens = [], []
    L = L0
    for l in range(n_layers):
        wf, L_out = _conv_as_matrix(feat_w[l], L, kernels[l], strides[l])
        wp, _ = _conv_as_matrix(pass_w[l], L, kernels[l], strides[l])
        blocks.append(chain @ wf)            # feat output of layer l as a function of x
        true_lens.append(L_out)
        chain = chain @ wp                   # pass chain feeding the next layer
        L = L_out
    blocks.append(chain)                     # final pass output (last feature)
    true_lens.append(L)

    # Lane-pad each block (zero rows beyond L0, zero cols beyond the true output length keep
    # the mean-pool exact because LeakyReLU(0) == 0) and fuse into one wide bf16 matrix.
    col_starts, col_widths, padded = [], [], []
    start = 0
    for b, tl in zip(blocks, true_lens):
        w_pad = _round_up(tl, 128)
        pb = np.zeros((L0_pad, w_pad), np.float64)
        pb[:L0, :tl] = b
        padded.append(pb)
        col_starts.append(start)
        col_widths.append(w_pad)
        start += w_pad
    w_big = jnp.asarray(np.concatenate(padded, axis=1), dtype=jnp.bfloat16)

    slopes_full = tuple(layer_slopes) + (layer_slopes[-1],)        # final feat uses activation_fn[-1]
    inv_lens = tuple(1.0 / float(t) for t in true_lens)
    config = FENetConfig(n_layers=n_layers, n_feat=n_layers + 1, L0_true=L0, L0_pad=L0_pad,
                         total_cols=start, col_starts=tuple(col_starts),
                         col_widths=tuple(col_widths), slopes=slopes_full, inv_lens=inv_lens)
    return w_big, config


def _make_fenet_kernel(config: FENetConfig, out_lanes: int):
    n_feat = config.n_feat
    starts, widths = config.col_starts, config.col_widths
    slopes, inv_lens = config.slopes, config.inv_lens

    def kernel(x_ref, w_ref, out_ref):
        x = x_ref[...]                                               # (row_tile, L0_pad) bf16
        # One wide MXU matmul: all layer feat outputs + final pass output at once (f32 acc).
        y = jnp.dot(x, w_ref[...], preferred_element_type=jnp.float32)
        cols = []
        for i in range(n_feat):
            s = y[:, starts[i]:starts[i] + widths[i]]                # lane-aligned static slice
            a = jnp.where(s >= 0, s, slopes[i] * s)                  # LeakyReLU(slope_i)
            cols.append(jnp.sum(a, axis=-1, keepdims=True) * inv_lens[i])   # AdaptiveAvgPool1d(1)
        # Lane-dense store: features in the first n_feat lanes, zeros to 128.
        pad = jnp.zeros((x.shape[0], out_lanes - n_feat), jnp.float32)
        out_ref[...] = jnp.concatenate(cols + [pad], axis=-1)

    return kernel


@partial(jax.jit, static_argnames=("config", "row_tile_max"))
def fenet_forward(x, w_big, config: FENetConfig, row_tile_max=256):
    """x: (batch, n_channels, n_samples) -> (batch, n_channels * (n_layers + 1))."""
    B, C, L0 = x.shape
    assert L0 == config.L0_true, (L0, config.L0_true)
    N = B * C
    n_feat = config.n_feat
    out_lanes = _round_up(n_feat, 128)

    # Row tile: multiple of 8, no larger than needed; give the 'parallel' axis >= 2 steps
    # (so the v7x megacore can shard it) whenever N is big enough.
    rt = min(row_tile_max, _round_up(N, 8))
    if _round_up(N, rt) // rt < 2 and N >= 16:
        rt = _round_up((N + 1) // 2, 8)
    N_pad = _round_up(N, rt)

    # bf16 input (halves per-step DMA bytes); pad only when shapes are not already aligned.
    x2 = x.reshape(N, L0).astype(jnp.bfloat16)
    if (N_pad - N) or (config.L0_pad - L0):
        x2 = jnp.pad(x2, ((0, N_pad - N), (0, config.L0_pad - L0)))

    # Explicit scoped-VMEM budget: resident weights (2 pipeline buffers) + streamed input /
    # output tiles (double-buffered) + the f32 matmul result tile, with generous headroom.
    w_bytes = config.L0_pad * config.total_cols * 2
    est = (2 * w_bytes
           + 2 * rt * config.L0_pad * 2
           + 2 * rt * out_lanes * 4
           + rt * config.total_cols * 4)
    vmem_limit = int(min(max(2 * est + (8 << 20), 32 << 20), 64 << 20))

    out = pl.pallas_call(
        _make_fenet_kernel(config, out_lanes),
        out_shape=jax.ShapeDtypeStruct((N_pad, out_lanes), jnp.float32),
        grid=(N_pad // rt,),
        in_specs=[
            pl.BlockSpec((rt, config.L0_pad), lambda i: (i, 0)),
            # Fused weight matrix: constant block index -> fetched once, stays resident.
            pl.BlockSpec((config.L0_pad, config.total_cols), lambda i: (0, 0)),
        ],
        out_specs=pl.BlockSpec((rt, out_lanes), lambda i: (i, 0)),
        compiler_params=pltpu.CompilerParams(
            dimension_semantics=("parallel",),
            vmem_limit_bytes=vmem_limit,
        ),
    )(x2, w_big)

    # (B*C, n_feat) -> (B, C * n_feat), matches torch .view(-1, n_channels * sum(features))
    return out[:N, :n_feat].reshape(B, C * n_feat)


def fenet_reference(x, feat_w, pass_w, kernels, strides, relu_powers):
    """Direct numpy re-implementation of the PyTorch forward (eval mode) for checking."""
    x = np.asarray(x, dtype=np.float64)
    B, C, L = x.shape
    cur = x.reshape(B * C, L)
    slopes = [-1.0 / (2 ** int(p)) for p in relu_powers]
    feats = []
    for l, (K, S) in enumerate(zip(kernels, strides)):
        left, right = max(K - S, 0), K - 1
        xp = np.pad(cur, ((0, 0), (left, right)))
        L_out = (xp.shape[1] - K) // S + 1
        wf = np.asarray(feat_w[l], dtype=np.float64)
        wp = np.asarray(pass_w[l], dtype=np.float64)
        fout = np.zeros((cur.shape[0], L_out))
        pout = np.zeros((cur.shape[0], L_out))
        for t in range(L_out):
            win = xp[:, t * S:t * S + K]
            fout[:, t] = win @ wf
            pout[:, t] = win @ wp
        fout = np.where(fout >= 0, fout, slopes[l] * fout)
        feats.append(fout.mean(axis=1))
        cur = pout
    final = np.where(cur >= 0, cur, slopes[-1] * cur)
    feats.append(final.mean(axis=1))
    out = np.stack(feats, axis=1)                      # (B*C, n_layers+1)
    return out.reshape(B, C * len(feats))


if __name__ == "__main__":
    # Small shapes consistent with the module: (batch, n_channels, n_samples).
    B, C, L = 2, 4, 128
    n_layers = 7
    kernels = [40] * n_layers
    strides = [2] * n_layers
    relu_powers = [0] * n_layers       # LeakyReLU(-1 / 2**0) == abs()

    key = jax.random.PRNGKey(0)
    kx, *kw = jax.random.split(key, 1 + 2 * n_layers)
    x = jax.random.normal(kx, (B, C, L), dtype=jnp.float32)

    # Deterministic Conv1d(1,1,K,bias=False) weights (torch kaiming-uniform-like bound).
    feat_w, pass_w = [], []
    for l in range(n_layers):
        bound = 1.0 / math.sqrt(kernels[l])
        feat_w.append(np.asarray(
            jax.random.uniform(kw[2 * l], (kernels[l],), jnp.float32, -bound, bound)))
        pass_w.append(np.asarray(
            jax.random.uniform(kw[2 * l + 1], (kernels[l],), jnp.float32, -bound, bound)))

    # Build the fused / precomposed weight matrix ONCE (per model), then run the jitted forward.
    w_big, config = build_fenet_params(feat_w, pass_w, kernels, strides, relu_powers, L)
    out = fenet_forward(x, w_big, config)
    out = jax.block_until_ready(out)

    ref = fenet_reference(np.asarray(x), feat_w, pass_w, kernels, strides, relu_powers)
    assert out.shape == (B, C * (n_layers + 1)), out.shape
    # bf16-input / f32-accumulate MXU matmul (weights composed in f64): bf16-level tolerance.
    np.testing.assert_allclose(np.asarray(out), ref, rtol=2e-2, atol=2e-3)
    print("KERNEL_OK")
</pallas_src>

<mosaic_0001>
module attributes {stable_mosaic.version = 11 : i64} {
  func.func @kernel(%arg0: i32, %arg1: memref<8x128xbf16, #tpu.memory_space<vmem>>, %arg2: memref<128x1024xbf16, #tpu.memory_space<vmem>>, %arg3: memref<8x128xf32, #tpu.memory_space<vmem>>) attributes {dimension_semantics = [#tpu.dimension_semantics<parallel>], iteration_bounds = array<i64: 1>, scalar_prefetch = 0 : i64, scratch_operands = 0 : i64, tpu.core_type = #tpu.core_type<tc>, window_params = [{transform_indices = @transform_0, window_bounds = array<i64: 8, 128>}, {pipeline_mode = #tpu.pipeline_mode<synchronous>, transform_indices = @transform_1, window_bounds = array<i64: 128, 1024>}, {transform_indices = @transform_2, window_bounds = array<i64: 8, 128>}]} {
    %c0 = arith.constant 0 : index
    %c0_0 = arith.constant 0 : index
    %0 = vector.load %arg1[%c0, %c0_0] : memref<8x128xbf16, #tpu.memory_space<vmem>>, vector<8x128xbf16>
    %c0_1 = arith.constant 0 : index
    %c0_2 = arith.constant 0 : index
    %1 = vector.load %arg2[%c0_1, %c0_2] : memref<128x1024xbf16, #tpu.memory_space<vmem>>, vector<128x1024xbf16>
    %cst = arith.constant dense<0.000000e+00> : vector<8x1024xf32>
    %2 = tpu.matmul %0, %1, %cst {dimension_numbers = #tpu.dot_dimension_numbers<[1], [0], [0], [1], [0, 0, 1, 1], [], []>} : vector<8x128xbf16>, vector<128x1024xbf16>, vector<8x1024xf32> -> vector<8x1024xf32>
    %3 = vector.extract_strided_slice %2 {offsets = [0, 0], sizes = [8, 128], strides = [1, 1]} : vector<8x1024xf32> to vector<8x128xf32>
    %cst_3 = arith.constant 0.000000e+00 : f32
    %4 = vector.broadcast %cst_3 : f32 to vector<8x128xf32>
    %5 = arith.cmpf oge, %3, %4 : vector<8x128xf32>
    %cst_4 = arith.constant -1.000000e+00 : f32
    %6 = vector.broadcast %cst_4 : f32 to vector<8x128xf32>
    %7 = arith.mulf %6, %3 : vector<8x128xf32>
    %8 = arith.select %5, %3, %7 : vector<8x128xi1>, vector<8x128xf32>
    %cst_5 = arith.constant dense<0.000000e+00> : vector<8xf32>
    %9 = vector.multi_reduction <add>, %8, %cst_5 [1] : vector<8x128xf32> to vector<8xf32>
    %10 = vector.shape_cast %9 : vector<8xf32> to vector<8x1xf32>
    %cst_6 = arith.constant 0.0120481923 : f32
    %11 = vector.broadcast %cst_6 : f32 to vector<8x1xf32>
    %12 = arith.mulf %10, %11 : vector<8x1xf32>
    %13 = vector.extract_strided_slice %2 {offsets = [0, 128], sizes = [8, 128], strides = [1, 1]} : vector<8x1024xf32> to vector<8x128xf32>
    %cst_7 = arith.constant 0.000000e+00 : f32
    %14 = vector.broadcast %cst_7 : f32 to vector<8x128xf32>
    %15 = arith.cmpf oge, %13, %14 : vector<8x128xf32>
    %cst_8 = arith.constant -1.000000e+00 : f32
    %16 = vector.broadcast %cst_8 : f32 to vector<8x128xf32>
    %17 = arith.mulf %16, %13 : vector<8x128xf32>
    %18 = arith.select %15, %13, %17 : vector<8x128xi1>, vector<8x128xf32>
    %cst_9 = arith.constant dense<0.000000e+00> : vector<8xf32>
    %19 = vector.multi_reduction <add>, %18, %cst_9 [1] : vector<8x128xf32> to vector<8xf32>
    %20 = vector.shape_cast %19 : vector<8xf32> to vector<8x1xf32>
    %cst_10 = arith.constant 0.0163934417 : f32
    %21 = vector.broadcast %cst_10 : f32 to vector<8x1xf32>
    %22 = arith.mulf %20, %21 : vector<8x1xf32>
    %23 = vector.extract_strided_slice %2 {offsets = [0, 256], sizes = [8, 128], strides = [1, 1]} : vector<8x1024xf32> to vector<8x128xf32>
    %cst_11 = arith.constant 0.000000e+00 : f32
    %24 = vector.broadcast %cst_11 : f32 to vector<8x128xf32>
    %25 = arith.cmpf oge, %23, %24 : vector<8x128xf32>
    %cst_12 = arith.constant -1.000000e+00 : f32
    %26 = vector.broadcast %cst_12 : f32 to vector<8x128xf32>
    %27 = arith.mulf %26, %23 : vector<8x128xf32>
    %28 = arith.select %25, %23, %27 : vector<8x128xi1>, vector<8x128xf32>
    %cst_13 = arith.constant dense<0.000000e+00> : vector<8xf32>
    %29 = vector.multi_reduction <add>, %28, %cst_13 [1] : vector<8x128xf32> to vector<8xf32>
    %30 = vector.shape_cast %29 : vector<8xf32> to vector<8x1xf32>
    %cst_14 = arith.constant 2.000000e-02 : f32
    %31 = vector.broadcast %cst_14 : f32 to vector<8x1xf32>
    %32 = arith.mulf %30, %31 : vector<8x1xf32>
    %33 = vector.extract_strided_slice %2 {offsets = [0, 384], sizes = [8, 128], strides = [1, 1]} : vector<8x1024xf32> to vector<8x128xf32>
    %cst_15 = arith.constant 0.000000e+00 : f32
    %34 = vector.broadcast %cst_15 : f32 to vector<8x128xf32>
    %35 = arith.cmpf oge, %33, %34 : vector<8x128xf32>
    %cst_16 = arith.constant -1.000000e+00 : f32
    %36 = vector.broadcast %cst_16 : f32 to vector<8x128xf32>
    %37 = arith.mulf %36, %33 : vector<8x128xf32>
    %38 = arith.select %35, %33, %37 : vector<8x128xi1>, vector<8x128xf32>
    %cst_17 = arith.constant dense<0.000000e+00> : vector<8xf32>
    %39 = vector.multi_reduction <add>, %38, %cst_17 [1] : vector<8x128xf32> to vector<8xf32>
    %40 = vector.shape_cast %39 : vector<8xf32> to vector<8x1xf32>
    %cst_18 = arith.constant 0.0227272734 : f32
    %41 = vector.broadcast %cst_18 : f32 to vector<8x1xf32>
    %42 = arith.mulf %40, %41 : vector<8x1xf32>
    %43 = vector.extract_strided_slice %2 {offsets = [0, 512], sizes = [8, 128], strides = [1, 1]} : vector<8x1024xf32> to vector<8x128xf32>
    %cst_19 = arith.constant 0.000000e+00 : f32
    %44 = vector.broadcast %cst_19 : f32 to vector<8x128xf32>
    %45 = arith.cmpf oge, %43, %44 : vector<8x128xf32>
    %cst_20 = arith.constant -1.000000e+00 : f32
    %46 = vector.broadcast %cst_20 : f32 to vector<8x128xf32>
    %47 = arith.mulf %46, %43 : vector<8x128xf32>
    %48 = arith.select %45, %43, %47 : vector<8x128xi1>, vector<8x128xf32>
    %cst_21 = arith.constant dense<0.000000e+00> : vector<8xf32>
    %49 = vector.multi_reduction <add>, %48, %cst_21 [1] : vector<8x128xf32> to vector<8xf32>
    %50 = vector.shape_cast %49 : vector<8xf32> to vector<8x1xf32>
    %cst_22 = arith.constant 0.024390243 : f32
    %51 = vector.broadcast %cst_22 : f32 to vector<8x1xf32>
    %52 = arith.mulf %50, %51 : vector<8x1xf32>
    %53 = vector.extract_strided_slice %2 {offsets = [0, 640], sizes = [8, 128], strides = [1, 1]} : vector<8x1024xf32> to vector<8x128xf32>
    %cst_23 = arith.constant 0.000000e+00 : f32
    %54 = vector.broadcast %cst_23 : f32 to vector<8x128xf32>
    %55 = arith.cmpf oge, %53, %54 : vector<8x128xf32>
    %cst_24 = arith.constant -1.000000e+00 : f32
    %56 = vector.broadcast %cst_24 : f32 to vector<8x128xf32>
    %57 = arith.mulf %56, %53 : vector<8x128xf32>
    %58 = arith.select %55, %53, %57 : vector<8x128xi1>, vector<8x128xf32>
    %cst_25 = arith.constant dense<0.000000e+00> : vector<8xf32>
    %59 = vector.multi_reduction <add>, %58, %cst_25 [1] : vector<8x128xf32> to vector<8xf32>
    %60 = vector.shape_cast %59 : vector<8xf32> to vector<8x1xf32>
    %cst_26 = arith.constant 2.500000e-02 : f32
    %61 = vector.broadcast %cst_26 : f32 to vector<8x1xf32>
    %62 = arith.mulf %60, %61 : vector<8x1xf32>
    %63 = vector.extract_strided_slice %2 {offsets = [0, 768], sizes = [8, 128], strides = [1, 1]} : vector<8x1024xf32> to vector<8x128xf32>
    %cst_27 = arith.constant 0.000000e+00 : f32
    %64 = vector.broadcast %cst_27 : f32 to vector<8x128xf32>
    %65 = arith.cmpf oge, %63, %64 : vector<8x128xf32>
    %cst_28 = arith.constant -1.000000e+00 : f32
    %66 = vector.broadcast %cst_28 : f32 to vector<8x128xf32>
    %67 = arith.mulf %66, %63 : vector<8x128xf32>
    %68 = arith.select %65, %63, %67 : vector<8x128xi1>, vector<8x128xf32>
    %cst_29 = arith.constant dense<0.000000e+00> : vector<8xf32>
    %69 = vector.multi_reduction <add>, %68, %cst_29 [1] : vector<8x128xf32> to vector<8xf32>
    %70 = vector.shape_cast %69 : vector<8xf32> to vector<8x1xf32>
    %cst_30 = arith.constant 0.025641026 : f32
    %71 = vector.broadcast %cst_30 : f32 to vector<8x1xf32>
    %72 = arith.mulf %70, %71 : vector<8x1xf32>
    %73 = vector.extract_strided_slice %2 {offsets = [0, 896], sizes = [8, 128], strides = [1, 1]} : vector<8x1024xf32> to vector<8x128xf32>
    %cst_31 = arith.constant 0.000000e+00 : f32
    %74 = vector.broadcast %cst_31 : f32 to vector<8x128xf32>
    %75 = arith.cmpf oge, %73, %74 : vector<8x128xf32>
    %cst_32 = arith.constant -1.000000e+00 : f32
    %76 = vector.broadcast %cst_32 : f32 to vector<8x128xf32>
    %77 = arith.mulf %76, %73 : vector<8x128xf32>
    %78 = arith.select %75, %73, %77 : vector<8x128xi1>, vector<8x128xf32>
    %cst_33 = arith.constant dense<0.000000e+00> : vector<8xf32>
    %79 = vector.multi_reduction <add>, %78, %cst_33 [1] : vector<8x128xf32> to vector<8xf32>
    %80 = vector.shape_cast %79 : vector<8xf32> to vector<8x1xf32>
    %cst_34 = arith.constant 0.025641026 : f32
    %81 = vector.broadcast %cst_34 : f32 to vector<8x1xf32>
    %82 = arith.mulf %80, %81 : vector<8x1xf32>
    %cst_35 = arith.constant 0.000000e+00 : f32
    %83 = vector.broadcast %cst_35 : f32 to vector<8x120xf32>
    %84 = tpu.concatenate %12, %22, %32, %42, %52, %62, %72, %82, %83 in 1 : vector<8x1xf32>, vector<8x1xf32>, vector<8x1xf32>, vector<8x1xf32>, vector<8x1xf32>, vector<8x1xf32>, vector<8x1xf32>, vector<8x1xf32>, vector<8x120xf32> -> vector<8x128xf32>
    %c0_36 = arith.constant 0 : index
    %c0_37 = arith.constant 0 : index
    %85 = vector.load %arg3[%c0_36, %c0_37] : memref<8x128xf32, #tpu.memory_space<vmem>>, vector<8x128xf32>
    tpu.vector_store %arg3[%c0_36, %c0_37], %84 {strides = array<i32>} : memref<8x128xf32, #tpu.memory_space<vmem>>, vector<8x128xf32>,
    return
  }
  func.func @transform_0(%arg0: i32) -> (i32, i32) {
    %c0_i32 = arith.constant 0 : i32
    %c0_i32_0 = arith.constant 0 : i32
    return %arg0, %c0_i32 : i32, i32
  }
  func.func @transform_1(%arg0: i32) -> (i32, i32) {
    %c0_i32 = arith.constant 0 : i32
    %c0_i32_0 = arith.constant 0 : i32
    %c0_i32_1 = arith.constant 0 : i32
    return %c0_i32, %c0_i32_0 : i32, i32
  }
  func.func @transform_2(%arg0: i32) -> (i32, i32) {
    %c0_i32 = arith.constant 0 : i32
    %c0_i32_0 = arith.constant 0 : i32
    return %arg0, %c0_i32 : i32, i32
  }
}

</mosaic_0001>

<bundles_post_ra>
// kernel: fenet_forward.1
= control target key start
LH: loop header
LB: loop body
LE: loop exit
PB: predicated region body
PF: predicated region fallthrough
CT: control target
= control target key end

     0   :  { %7 = vsyncpa [#allocation3], 0  ;;  %s735_s9 = smov [#allocation2]   ;;  %s773_s0 = inlined_call_operand.vmem [shape: bf16[8,128], index: 0, kind: input, shape index: {}]   ;;  %s774_s1 = inlined_call_operand.hbm [shape: bf16[128,1024], index: 1, kind: input, shape index: {}]   ;;  %s775_s2 = inlined_call_operand.vmem [shape: f32[8,128], index: 2, kind: output, shape index: {}]  }
   0x1   :  { %s15_s10 = sshll.u32 %s735_s9, 4  ;;  %s16_s10 = int_to_ptr.vmem [resolvable:$true] %s15_s10 }
   0x2   :  { %s721_s11 = scalar_lea.vmem %s16_s10, 8192  ;;  %p726_p1 = scmp.lt.s32.totalorder %s16_s10, %s16_s10 }
   0x3   :  { %p722_p0 = scmp.ne.s32.totalorder %s16_s10, %s721_s11  ;;  %p727_p2 = scmp.lt.s32.totalorder %s721_s11, %s721_s11 }
   0x5   :  { %p728_p3 = por %p727_p2, %p726_p1 }
   0x7   :  { %p729_p4 = pnand %p728_p3, %p722_p0 }
   0x9   :  { %732 = shalt.err (!%p729_p4)
}
   0xa   :  { %s736_s12 = smov 512   ;;  %s737_s13 = smov 32  }
   0xb   :  { %21 = dma.hbm_to_vmem [thread:$0]  %s774_s1, 8192, %s16_s10, [#allocation3], %s736_s12, %s736_s12, %s737_s13  }
   0xc   :  { %733 = dma.done.wait [#allocation3], 8192  }
   0xd   :  { %734 = vsyncadd [#allocation3], 4294959104  ;;  %v738_v0 = vmov 0   ;;  %v83_v1 = vld [vmem:[#allocation2 + $0x1c0] sm:$0xff]  ;;  %v84_v3 = vld [vmem:[#allocation2 + $0x1c8] sm:$0xff]  ;;  %vm623_vm8 = vcmask 7168  }
   0xe   :  { %443 = vmatprep.mubr.bf16.mxu0 %v738_v0  ;;  %484 = vmatprep.mubr.bf16.mxu1 %v738_v0  ;;  %v87_v2 = vld [vmem:[#allocation2 + $0x1e0] sm:$0xff]  ;;  %v88_v5 = vld [vmem:[#allocation2 + $0x1e8] sm:$0xff]  ;;  %v85_v63 = vld [vmem:[#allocation2 + $0x1d0] sm:$0xff]  ;;  %vm625_vm9 = vcmask 15360   ;;  %vm627_vm10 = vcmask 23552   ;;  %vm629_vm11 = vcmask 31744  }
   0xf   :  { %v702_v4 = vcombine.high %v83_v1, %v87_v2  ;;  %v701_v6 = vcombine.low %v83_v1, %v87_v2  ;;  %v75_v7 = vld [vmem:[#allocation2 + $0x180] sm:$0xff]  ;;  %v704_v9 = vcombine.high %v84_v3, %v88_v5  ;;  %v703_v10 = vcombine.low %v84_v3, %v88_v5  ;;  %v76_v12 = vld [vmem:[#allocation2 + $0x188] sm:$0xff]  ;;  %v89_v1 = vld [vmem:[#allocation2 + $0x1f0] sm:$0xff] }
  0x10   :  { %v79_v8 = vld [vmem:[#allocation2 + $0x1a0] sm:$0xff]  ;;  %v80_v13 = vld [vmem:[#allocation2 + $0x1a8] sm:$0xff]  ;;  %v86_v2 = vld [vmem:[#allocation2 + $0x1d8] sm:$0xff]  ;;  %vm631_vm12 = vcmask 39936   ;;  %vm633_vm13 = vcmask 48128   ;;  %vm635_vm14 = vcmask 56320  }
  0x11   :  { %v694_v11 = vcombine.high %v75_v7, %v79_v8  ;;  %v67_v14 = vld [vmem:[#allocation2 + $0x140] sm:$0xff]  ;;  %411 = vmatprep.subr.bf16.mxu0 %v702_v4  ;;  %v696_v15 = vcombine.high %v76_v12, %v80_v13  ;;  %v68_v17 = vld [vmem:[#allocation2 + $0x148] sm:$0xff]  ;;  %452 = vmatprep.subr.bf16.mxu1 %v704_v9  ;;  %v693_v19 = vcombine.low %v75_v7, %v79_v8  ;;  %v90_v3 = vld [vmem:[#allocation2 + $0x1f8] sm:$0xff]  ;;  %vm637_vm15 = vcmask 64512  }
  0x12   :  { %v71_v16 = vld [vmem:[#allocation2 + $0x160] sm:$0xff]  ;;  %v72_v18 = vld [vmem:[#allocation2 + $0x168] sm:$0xff]  ;;  %412 = vmatpush1.bf16.msra.mxu0 %v701_v6  ;;  %453 = vmatpush1.bf16.msra.mxu1 %v703_v10  ;;  %v695_v20 = vcombine.low %v76_v12, %v80_v13  ;;  %v706_v6 = vcombine.high %v85_v63, %v89_v1  ;;  %v708_v7 = vcombine.high %v86_v2, %v90_v3  ;;  %v77_v8 = vld [vmem:[#allocation2 + $0x190] sm:$0xff] }
  0x13   :  { %413 = vmatprep.subr.bf16.mxu0 %v694_v11  ;;  %v686_v21 = vcombine.high %v67_v14, %v71_v16  ;;  %454 = vmatprep.subr.bf16.mxu1 %v696_v15  ;;  %v688_v22 = vcombine.high %v68_v17, %v72_v18  ;;  %v59_v23 = vld [vmem:[#allocation2 + $0x100] sm:$0xff]  ;;  %v60_v25 = vld [vmem:[#allocation2 + $0x108] sm:$0xff]  ;;  %v685_v27 = vcombine.low %v67_v14, %v71_v16  ;;  %v81_v9 = vld [vmem:[#allocation2 + $0x1b0] sm:$0xff] }
  0x14   :  { %v63_v24 = vld [vmem:[#allocation2 + $0x120] sm:$0xff]  ;;  %v64_v26 = vld [vmem:[#allocation2 + $0x128] sm:$0xff]  ;;  %v687_v28 = vcombine.low %v68_v17, %v72_v18  ;;  %v78_v10 = vld [vmem:[#allocation2 + $0x198] sm:$0xff]  ;;  %v705_v13 = vcombine.low %v85_v63, %v89_v1  ;;  %v707_v14 = vcombine.low %v86_v2, %v90_v3  ;;  %v698_v15 = vcombine.high %v77_v8, %v81_v9 }
  0x15   :  { %v678_v29 = vcombine.high %v59_v23, %v63_v24  ;;  %v680_v30 = vcombine.high %v60_v25, %v64_v26  ;;  %v51_v31 = vld [vmem:[#allocation2 + $0xc0] sm:$0xff]  ;;  %v52_v33 = vld [vmem:[#allocation2 + $0xc8] sm:$0xff]  ;;  %v677_v35 = vcombine.low %v59_v23, %v63_v24  ;;  %v679_v36 = vcombine.low %v60_v25, %v64_v26  ;;  %v82_v11 = vld [vmem:[#allocation2 + $0x1b8] sm:$0xff] }
  0x16   :  { %414 = vmatpush1.bf16.msra.mxu0 %v693_v19  ;;  %455 = vmatpush1.bf16.msra.mxu1 %v695_v20  ;;  %v55_v32 = vld [vmem:[#allocation2 + $0xe0] sm:$0xff]  ;;  %v56_v34 = vld [vmem:[#allocation2 + $0xe8] sm:$0xff]  ;;  %v700_v16 = vcombine.high %v78_v10, %v82_v11  ;;  %v69_v17 = vld [vmem:[#allocation2 + $0x150] sm:$0xff] }
  0x17   :  { %415 = vmatprep.subr.bf16.mxu0 %v686_v21  ;;  %456 = vmatprep.subr.bf16.mxu1 %v688_v22  ;;  %v670_v37 = vcombine.high %v51_v31, %v55_v32  ;;  %v672_v38 = vcombine.high %v52_v33, %v56_v34  ;;  %v43_v39 = vld [vmem:[#allocation2 + $0x80] sm:$0xff]  ;;  %v44_v41 = vld [vmem:[#allocation2 + $0x88] sm:$0xff]  ;;  %v669_v43 = vcombine.low %v51_v31, %v55_v32  ;;  %v73_v18 = vld [vmem:[#allocation2 + $0x170] sm:$0xff] }
  0x18   :  { %v47_v40 = vld [vmem:[#allocation2 + $0xa0] sm:$0xff]  ;;  %v48_v42 = vld [vmem:[#allocation2 + $0xa8] sm:$0xff]  ;;  %v671_v44 = vcombine.low %v52_v33, %v56_v34  ;;  %v70_v19 = vld [vmem:[#allocation2 + $0x158] sm:$0xff]  ;;  %v697_v21 = vcombine.low %v77_v8, %v81_v9  ;;  %v699_v22 = vcombine.low %v78_v10, %v82_v11  ;;  %v690_v23 = vcombine.high %v69_v17, %v73_v18 }
  0x19   :  { %v662_v45 = vcombine.high %v43_v39, %v47_v40  ;;  %v664_v46 = vcombine.high %v44_v41, %v48_v42  ;;  %v35_v47 = vld [vmem:[#allocation2 + $0x40] sm:$0xff]  ;;  %v36_v49 = vld [vmem:[#allocation2 + $0x48] sm:$0xff]  ;;  %v661_v51 = vcombine.low %v43_v39, %v47_v40  ;;  %v663_v52 = vcombine.low %v44_v41, %v48_v42  ;;  %v74_v20 = vld [vmem:[#allocation2 + $0x178] sm:$0xff] }
  0x1a   :  { %416 = vmatpush1.bf16.msra.mxu0 %v685_v27  ;;  %457 = vmatpush1.bf16.msra.mxu1 %v687_v28  ;;  %v39_v48 = vld [vmem:[#allocation2 + $0x60] sm:$0xff]  ;;  %v40_v50 = vld [vmem:[#allocation2 + $0x68] sm:$0xff]  ;;  %v692_v24 = vcombine.high %v70_v19, %v74_v20  ;;  %v61_v25 = vld [vmem:[#allocation2 + $0x110] sm:$0xff] }
  0x1b   :  { %417 = vmatprep.subr.bf16.mxu0 %v678_v29  ;;  %458 = vmatprep.subr.bf16.mxu1 %v680_v30  ;;  %v654_v53 = vcombine.high %v35_v47, %v39_v48  ;;  %v656_v54 = vcombine.high %v36_v49, %v40_v50  ;;  %v27_v55 = vld [vmem:[#allocation2] sm:$0xff]  ;;  %v28_v57 = vld [vmem:[#allocation2 + $0x8] sm:$0xff]  ;;  %v653_v59 = vcombine.low %v35_v47, %v39_v48  ;;  %v65_v26 = vld [vmem:[#allocation2 + $0x130] sm:$0xff] }
  0x1c   :  { %v31_v56 = vld [vmem:[#allocation2 + $0x20] sm:$0xff]  ;;  %v32_v58 = vld [vmem:[#allocation2 + $0x28] sm:$0xff]  ;;  %v655_v60 = vcombine.low %v36_v49, %v40_v50  ;;  %v62_v27 = vld [vmem:[#allocation2 + $0x118] sm:$0xff]  ;;  %v689_v29 = vcombine.low %v69_v17, %v73_v18  ;;  %v691_v30 = vcombine.low %v70_v19, %v74_v20  ;;  %v682_v31 = vcombine.high %v61_v25, %v65_v26 }
  0x1d   :  { %v646_v61 = vcombine.high %v27_v55, %v31_v56  ;;  %v648_v62 = vcombine.high %v28_v57, %v32_v58  ;;  %v645_v4 = vcombine.low %v27_v55, %v31_v56  ;;  %v647_v5 = vcombine.low %v28_v57, %v32_v58  ;;  %v762_v12 = vld [vmem:[%s773_s0] sm:$0xf]  ;;  %v66_v28 = vld [vmem:[#allocation2 + $0x138] sm:$0xff]  ;;  %v53_v33 = vld [vmem:[#allocation2 + $0xd0] sm:$0xff] }
  0x1e   :  { %418 = vmatpush1.bf16.msra.mxu0 %v677_v35  ;;  %459 = vmatpush1.bf16.msra.mxu1 %v679_v36  ;;  %v684_v32 = vcombine.high %v62_v27, %v66_v28  ;;  %v57_v34 = vld [vmem:[#allocation2 + $0xf0] sm:$0xff]  ;;  %v54_v35 = vld [vmem:[#allocation2 + $0xd8] sm:$0xff] }
  0x1f   :  { %419 = vmatprep.subr.bf16.mxu0 %v670_v37  ;;  %460 = vmatprep.subr.bf16.mxu1 %v672_v38  ;;  %v58_v36 = vld [vmem:[#allocation2 + $0xf8] sm:$0xff]  ;;  %v681_v37 = vcombine.low %v61_v25, %v65_v26  ;;  %v683_v38 = vcombine.low %v62_v27, %v66_v28  ;;  %v674_v39 = vcombine.high %v53_v33, %v57_v34  ;;  %v45_v40 = vld [vmem:[#allocation2 + $0x90] sm:$0xff] }
  0x20   :  { %v49_v41 = vld [vmem:[#allocation2 + $0xb0] sm:$0xff]  ;;  %v46_v42 = vld [vmem:[#allocation2 + $0x98] sm:$0xff] }
  0x21   :  { %v37_v48 = vld [vmem:[#allocation2 + $0x50] sm:$0xff]  ;;  %v38_v50 = vld [vmem:[#allocation2 + $0x58] sm:$0xff] }
  0x22   :  { %420 = vmatpush1.bf16.msra.mxu0 %v669_v43  ;;  %461 = vmatpush1.bf16.msra.mxu1 %v671_v44  ;;  %v50_v43 = vld [vmem:[#allocation2 + $0xb8] sm:$0xff]  ;;  %v673_v44 = vcombine.low %v53_v33, %v57_v34  ;;  %v41_v49 = vld [vmem:[#allocation2 + $0x70] sm:$0xff] }
  0x23   :  { %421 = vmatprep.subr.bf16.mxu0 %v662_v45  ;;  %462 = vmatprep.subr.bf16.mxu1 %v664_v46  ;;  %v675_v45 = vcombine.low %v54_v35, %v58_v36  ;;  %v666_v46 = vcombine.high %v45_v40, %v49_v41  ;;  %v668_v47 = vcombine.high %v46_v42, %v50_v43  ;;  %v29_v56 = vld [vmem:[#allocation2 + $0x10] sm:$0xff]  ;;  %v30_v58 = vld [vmem:[#allocation2 + $0x18] sm:$0xff] }
  0x24   :  { %v33_v57 = vld [vmem:[#allocation2 + $0x30] sm:$0xff] }
  0x25   :  { %v649_v1 = vcombine.low %v29_v56, %v33_v57 }
  0x26   :  { %422 = vmatpush1.bf16.msra.mxu0 %v661_v51  ;;  %463 = vmatpush1.bf16.msra.mxu1 %v663_v52  ;;  %v42_v51 = vld [vmem:[#allocation2 + $0x78] sm:$0xff]  ;;  %v665_v52 = vcombine.low %v45_v40, %v49_v41 }
  0x27   :  { %423 = vmatprep.subr.bf16.mxu0 %v654_v53  ;;  %464 = vmatprep.subr.bf16.mxu1 %v656_v54  ;;  %v667_v53 = vcombine.low %v46_v42, %v50_v43  ;;  %v658_v54 = vcombine.high %v37_v48, %v41_v49  ;;  %v660_v55 = vcombine.high %v38_v50, %v42_v51 }
  0x2a   :  { %424 = vmatpush1.bf16.msra.mxu0 %v653_v59  ;;  %465 = vmatpush1.bf16.msra.mxu1 %v655_v60  ;;  %v34_v59 = vld [vmem:[#allocation2 + $0x38] sm:$0xff]  ;;  %v657_v60 = vcombine.low %v37_v48, %v41_v49 }
  0x2b   :  { %425 = vmatprep.subr.bf16.mxu0 %v646_v61  ;;  %466 = vmatprep.subr.bf16.mxu1 %v648_v62  ;;  %v659_v61 = vcombine.low %v38_v50, %v42_v51  ;;  %v650_v62 = vcombine.high %v29_v56, %v33_v57  ;;  %v652_v63 = vcombine.high %v30_v58, %v34_v59 }
  0x2c   :  { %v651_v2 = vcombine.low %v30_v58, %v34_v59 }
  0x2e   :  { %426 = vmatpush1.bf16.msra.mxu0 %v645_v4  ;;  %467 = vmatpush1.bf16.msra.mxu1 %v647_v5 }
  0x2f   :  { %493 = vmatprep.subr.bf16.mxu0 %v706_v6  ;;  %534 = vmatprep.subr.bf16.mxu1 %v708_v7 }
  0x31   :  { %444 = vmatmul.mubr.bf16.vlgmr.msra.gmra.mxu0 %v762_v12  ;;  %485 = vmatmul.mubr.bf16.vlgmr.msra.gmra.mxu1 %v762_v12 }
  0x32   :  { %494 = vmatpush1.bf16.msra.mxu0 %v705_v13  ;;  %535 = vmatpush1.bf16.msra.mxu1 %v707_v14 }
  0x33   :  { %495 = vmatprep.subr.bf16.mxu0 %v698_v15  ;;  %536 = vmatprep.subr.bf16.mxu1 %v700_v16 }
  0x34   :  { %525 = vmatprep.mubr.bf16.mxu0 %v738_v0  ;;  %566 = vmatprep.mubr.bf16.mxu1 %v738_v0  ;;  %v676_v0 = vcombine.high %v54_v35, %v58_v36 }
  0x36   :  { %496 = vmatpush1.bf16.msra.mxu0 %v697_v21  ;;  %537 = vmatpush1.bf16.msra.mxu1 %v699_v22 }
  0x37   :  { %497 = vmatprep.subr.bf16.mxu0 %v690_v23  ;;  %538 = vmatprep.subr.bf16.mxu1 %v692_v24 }
  0x3a   :  { %498 = vmatpush1.bf16.msra.mxu0 %v689_v29  ;;  %539 = vmatpush1.bf16.msra.mxu1 %v691_v30 }
  0x3b   :  { %499 = vmatprep.subr.bf16.mxu0 %v682_v31  ;;  %540 = vmatprep.subr.bf16.mxu1 %v684_v32 }
  0x3e   :  { %500 = vmatpush1.bf16.msra.mxu0 %v681_v37  ;;  %541 = vmatpush1.bf16.msra.mxu1 %v683_v38 }
  0x3f   :  { %501 = vmatprep.subr.bf16.mxu0 %v674_v39  ;;  %542 = vmatprep.subr.bf16.mxu1 %v676_v0 }
  0x42   :  { %502 = vmatpush1.bf16.msra.mxu0 %v673_v44  ;;  %543 = vmatpush1.bf16.msra.mxu1 %v675_v45 }
  0x43   :  { %503 = vmatprep.subr.bf16.mxu0 %v666_v46  ;;  %544 = vmatprep.subr.bf16.mxu1 %v668_v47 }
  0x46   :  { %504 = vmatpush1.bf16.msra.mxu0 %v665_v52  ;;  %545 = vmatpush1.bf16.msra.mxu1 %v667_v53 }
  0x47   :  { %505 = vmatprep.subr.bf16.mxu0 %v658_v54  ;;  %546 = vmatprep.subr.bf16.mxu1 %v660_v55 }
  0x4a   :  { %506 = vmatpush1.bf16.msra.mxu0 %v657_v60  ;;  %547 = vmatpush1.bf16.msra.mxu1 %v659_v61 }
  0x4b   :  { %507 = vmatprep.subr.bf16.mxu0 %v650_v62  ;;  %548 = vmatprep.subr.bf16.mxu1 %v652_v63 }
  0x4e   :  { %508 = vmatpush1.bf16.msra.mxu0 %v649_v1  ;;  %549 = vmatpush1.bf16.msra.mxu1 %v651_v2 }
  0x51   :  { %526 = vmatmul.mubr.bf16.vlgmr.msra.gmra.mxu0 %v762_v12  ;;  %567 = vmatmul.mubr.bf16.vlgmr.msra.gmra.mxu1 %v762_v12 }
  0xf1   :  { %v445_v3 = vpop.f32.mrf.mxu0  ;;  %v486_v5 = vpop.f32.mrf.mxu1 }
  0xf2   :  { %v576_v4 = vmul.f32 -1.0, %v445_v3  ;;  %vm575_vm0 = vcmp.ge.f32.partialorder %v445_v3, 0.0  ;;  %v588_v6 = vmul.f32 -1.0, %v486_v5  ;;  %vm587_vm1 = vcmp.ge.f32.partialorder %v486_v5, 0.0 }
  0xf3   :  { %v447_v7 = vpop.f32.mrf.mxu0  ;;  %v488_v9 = vpop.f32.mrf.mxu1 }
  0xf4   :  { %v582_v8 = vmul.f32 -1.0, %v447_v7  ;;  %v577_v10 = vsel %vm575_vm0, %v445_v3, %v576_v4  ;;  %v594_v11 = vmul.f32 -1.0, %v488_v9  ;;  %v589_v13 = vsel %vm587_vm1, %v486_v5, %v588_v6 }
  0xf5   :  { %578 = vadd.xlane.f32.xlu0 %v577_v10  ;;  %v449_v14 = vpop.f32.mrf.mxu0  ;;  %vm593_vm2 = vcmp.ge.f32.partialorder %v488_v9, 0.0  ;;  %vm581_vm3 = vcmp.ge.f32.partialorder %v447_v7, 0.0  ;;  %590 = vadd.xlane.f32.xlu1 %v589_v13  ;;  %v490_v15 = vpop.f32.mrf.mxu1 }
  0xf6   :  { %v595_v12 = vsel %vm593_vm2, %v488_v9, %v594_v11  ;;  %v583_v18 = vsel %vm581_vm3, %v447_v7, %v582_v8 }
  0xf7   :  { %v450_v16 = vpop.f32.mrf.mxu0  ;;  %v491_v17 = vpop.f32.mrf.mxu1 }
  0xf9   :  { %584 = vadd.xlane.f32.xlu0 %v583_v18  ;;  %596 = vadd.xlane.f32.xlu1 %v595_v12 }
 0x111   :  { %v527_v19 = vpop.f32.mrf.mxu0  ;;  %v568_v21 = vpop.f32.mrf.mxu1 }
 0x112   :  { %v600_v20 = vmul.f32 -1.0, %v527_v19  ;;  %vm599_vm4 = vcmp.ge.f32.partialorder %v527_v19, 0.0  ;;  %v612_v23 = vmul.f32 -1.0, %v568_v21  ;;  %vm611_vm6 = vcmp.ge.f32.partialorder %v568_v21, 0.0 }
 0x113   :  { %v529_v22 = vpop.f32.mrf.mxu0  ;;  %v570_v25 = vpop.f32.mrf.mxu1 }
 0x114   :  { %v606_v24 = vmul.f32 -1.0, %v529_v22  ;;  %v601_v26 = vsel %vm599_vm4, %v527_v19, %v600_v20  ;;  %vm605_vm5 = vcmp.ge.f32.partialorder %v529_v22, 0.0  ;;  %v618_v28 = vmul.f32 -1.0, %v570_v25 }
 0x115   :  { %602 = vadd.xlane.f32.xlu0 %v601_v26  ;;  %v531_v27 = vpop.f32.mrf.mxu0  ;;  %v572_v29 = vpop.f32.mrf.mxu1  ;;  %vm617_vm7 = vcmp.ge.f32.partialorder %v570_v25, 0.0  ;;  %v613_v33 = vsel %vm611_vm6, %v568_v21, %v612_v23 }
 0x116   :  { %v607_v30 = vsel %vm605_vm5, %v529_v22, %v606_v24  ;;  %v619_v34 = vsel %vm617_vm7, %v570_v25, %v618_v28 }
 0x117   :  { %608 = vadd.xlane.f32.xlu1 %v607_v30  ;;  %v532_v31 = vpop.f32.mrf.mxu0  ;;  %v573_v32 = vpop.f32.mrf.mxu1 }
 0x119   :  { %614 = vadd.xlane.f32.xlu0 %v613_v33 }
 0x11b   :  { %620 = vadd.xlane.f32.xlu1 %v619_v34 }
 0x17e   :  { %v579_v35 = vpop.xlane.xlu0 %578  ;;  %v591_v37 = vpop.xlane.xlu1 %590 }
 0x17f   :  { %v580_v39 = vmul.f32 0.012048192, %v579_v35  ;;  %v592_v40 = vmul.f32 0.02, %v591_v37 }
 0x182   :  { %v585_v36 = vpop.xlane.xlu0 %584  ;;  %v597_v41 = vpop.xlane.xlu1 %596 }
 0x183   :  { %v586_v38 = vmul.f32 0.016393442, %v585_v36  ;;  %v598_v43 = vmul.f32 0.022727273, %v597_v41 }
 0x185   :  { %v624_v0 = vsel %vm623_vm8, %v580_v39, %v586_v38 }
 0x186   :  { %v626_v42 = vsel %vm625_vm9, %v624_v0, %v592_v40 }
 0x187   :  { %v628_v46 = vsel %vm627_vm10, %v626_v42, %v598_v43 }
 0x19e   :  { %v603_v44 = vpop.xlane.xlu0 %602 }
 0x19f   :  { %v604_v45 = vmul.f32 0.024390243, %v603_v44 }
 0x1a0   :  { %v609_v47 = vpop.xlane.xlu1 %608 }
 0x1a1   :  { %v630_v48 = vsel %vm629_vm11, %v628_v46, %v604_v45  ;;  %v610_v49 = vmul.f32 0.025, %v609_v47 }
 0x1a2   :  { %v615_v50 = vpop.xlane.xlu0 %614 }
 0x1a3   :  { %v632_v51 = vsel %vm631_vm12, %v630_v48, %v610_v49  ;;  %v616_v52 = vmul.f32 0.025641026, %v615_v50 }
 0x1a4   :  { %v621_v53 = vpop.xlane.xlu1 %620 }
 0x1a5   :  { %v634_v54 = vsel %vm633_vm13, %v632_v51, %v616_v52  ;;  %v622_v55 = vmul.f32 0.025641026, %v621_v53 }
 0x1a7   :  { %v636_v56 = vsel %vm635_vm14, %v634_v54, %v622_v55 }
 0x1a8   :  { %v638_v57 = vsel %vm637_vm15, %v636_v56, 0.0 }
 0x1a9   :  { %639 = vst [vmem:[%s775_s2] sm:$0xff] %v638_v57 }
 0x1aa   :  { %644 = vsyncpa [#allocation3], 1 }

</bundles_post_ra>
